<compile_context>
chip_gen: v6e
topology: v6e:2x2x1
jax: 0.10.0
libtpu: 0.0.40
codegen_flags: <defaults>
</compile_context>

<pallas_src>
import functools

import jax
import jax.numpy as jnp
from jax.experimental import pallas as pl
from jax.experimental.pallas import tpu as pltpu


def _round_up(x, m):
    return ((x + m - 1) // m) * m


def _conv1x1_kernel(x_ref, w_ref, b_ref, o_ref, *, use_mxu):
    # x_ref: (1, C_in, T)   w_ref: (C_out, C_in)   b_ref: (C_out, 1)
    # o_ref: (1, C_out, T)
    x = x_ref[0]                       # (C_in, T)
    w = w_ref[...]                     # (C_out, C_in)
    b = b_ref[...]                     # (C_out, 1)

    if use_mxu:
        acc = jnp.dot(w, x, preferred_element_type=jnp.float32)   # (C_out, T)
    else:
        # VPU broadcast-MAC: spatial stays on lanes, tiny channel loop is
        # unrolled at trace time (static C_in).
        c_in = x.shape[0]
        c_out = w.shape[0]
        acc = jnp.zeros((c_out, x.shape[1]), jnp.float32)
        for ci in range(c_in):
            acc = acc + w[:, ci:ci + 1].astype(jnp.float32) * \
                        x[ci:ci + 1, :].astype(jnp.float32)

    o_ref[0] = (acc + b).astype(o_ref.dtype)


def _pick_spatial_tile(hw, c_in, c_out, itemsize):
    # Budget ~12 MiB for the double-buffered input+output tiles so we stay
    # comfortably inside scoped VMEM on every generation (incl. v7x 64 MiB).
    budget = 12 * 1024 * 1024
    per_col = 2 * (c_in + c_out) * itemsize          # double-buffered in + out
    t = budget // max(per_col, 1)
    t = max(128, min(2048, (t // 128) * 128))        # multiple of 128, 128..2048
    t = min(t, _round_up(hw, 128))                   # don't exceed (padded) HW
    return int(t)


def conv_reducer_forward(x, weight, bias):
    """1x1 Conv2d forward (matches nn.Conv2d(C_in, C_out, 1, 1, 0)).

    Args:
      x:      (N, C_in, H, W)      float32 (NCHW)
      weight: (C_out, C_in, 1, 1)  float32 (PyTorch Conv2d weight layout)
      bias:   (C_out,)             float32

    Returns:
      (N, C_out, H, W) float32
    """
    N, C_in, H, W = x.shape
    C_out = weight.shape[0]
    HW = H * W
    itemsize = jnp.dtype(x.dtype).itemsize

    # Free views — no transposes, stays NCHW.
    x_rows = x.reshape(N, C_in, HW)
    w_mat = weight.reshape(C_out, C_in)
    b_col = bias.reshape(C_out, 1)

    t_hw = _pick_spatial_tile(HW, C_in, C_out, itemsize)
    HW_pad = _round_up(HW, t_hw)
    if HW_pad != HW:
        x_rows = jnp.pad(x_rows, ((0, 0), (0, 0), (0, HW_pad - HW)))

    grid = (N, HW_pad // t_hw)

    # Tiny channel counts -> VPU broadcast-MAC; otherwise MXU matmul.
    use_mxu = not (C_in <= 16 and C_out <= 64)

    tile_bytes = 2 * (C_in + C_out) * t_hw * itemsize      # double-buffered tiles
    w_bytes = 2 * C_out * C_in * itemsize
    vmem_limit = max(32 * 1024 * 1024,
                     min(int(1.5 * (tile_bytes + w_bytes)) + (16 << 20), 96 << 20))

    out = pl.pallas_call(
        functools.partial(_conv1x1_kernel, use_mxu=use_mxu),
        out_shape=jax.ShapeDtypeStruct((N, C_out, HW_pad), x.dtype),
        grid_spec=pltpu.PrefetchScalarGridSpec(
            num_scalar_prefetch=0,
            grid=grid,
            in_specs=[
                pl.BlockSpec((1, C_in, t_hw), lambda n, j: (n, 0, j)),
                pl.BlockSpec((C_out, C_in), lambda n, j: (0, 0)),
                pl.BlockSpec((C_out, 1), lambda n, j: (0, 0)),
            ],
            out_specs=pl.BlockSpec((1, C_out, t_hw), lambda n, j: (n, 0, j)),
        ),
        compiler_params=pltpu.CompilerParams(
            dimension_semantics=("parallel", "parallel"),
            vmem_limit_bytes=vmem_limit),
    )(x_rows, w_mat, b_col)

    if HW_pad != HW:
        out = out[:, :, :HW]
    return out.reshape(N, C_out, H, W)


if __name__ == "__main__":
    key = jax.random.PRNGKey(0)

    def run_case(N, C_in, C_out, H, W, k):
        kx, kw, kb = jax.random.split(k, 3)
        x = jax.random.normal(kx, (N, C_in, H, W), dtype=jnp.float32)
        weight = jax.random.normal(kw, (C_out, C_in, 1, 1), dtype=jnp.float32) * 0.1
        bias = jax.random.normal(kb, (C_out,), dtype=jnp.float32) * 0.1

        y = conv_reducer_forward(x, weight, bias)
        jax.block_until_ready(y)

        ref = jnp.einsum("nchw,oc->nohw", x, weight.reshape(C_out, C_in)) \
              + bias.reshape(1, C_out, 1, 1)
        assert y.shape == (N, C_out, H, W)
        assert jnp.allclose(y, ref, atol=1e-4, rtol=1e-4), \
            f"mismatch at shape {(N, C_in, C_out, H, W)}"

    k1, k2 = jax.random.split(key, 2)
    # Spec-consistent small shape (VPU broadcast-MAC path).
    run_case(2, 4, 8, 16, 16, k1)
    # Larger channels + ragged spatial (MXU path + padding path).
    run_case(1, 64, 64, 15, 15, k2)

    print("KERNEL_OK")
</pallas_src>

<mosaic_0001>
module attributes {stable_mosaic.version = 11 : i64} {
  func.func @_conv1x1_kernel(%arg0: i32, %arg1: i32, %arg2: memref<1x4x256xf32, #tpu.memory_space<vmem>>, %arg3: memref<8x4xf32, #tpu.memory_space<vmem>>, %arg4: memref<8x1xf32, #tpu.memory_space<vmem>>, %arg5: memref<1x8x256xf32, #tpu.memory_space<vmem>>) attributes {dimension_semantics = [#tpu.dimension_semantics<parallel>, #tpu.dimension_semantics<parallel>], iteration_bounds = array<i64: 2, 1>, scalar_prefetch = 0 : i64, scratch_operands = 0 : i64, tpu.core_type = #tpu.core_type<tc>, window_params = [{transform_indices = @transform_0, window_bounds = array<i64: 1, 4, 256>}, {pipeline_mode = #tpu.pipeline_mode<synchronous>, transform_indices = @transform_1, window_bounds = array<i64: 8, 4>}, {pipeline_mode = #tpu.pipeline_mode<synchronous>, transform_indices = @transform_2, window_bounds = array<i64: 8, 1>}, {transform_indices = @transform_3, window_bounds = array<i64: 1, 8, 256>}]} {
    %c0 = arith.constant 0 : index
    %c0_0 = arith.constant 0 : index
    %c0_1 = arith.constant 0 : index
    %0 = vector.load %arg2[%c0, %c0_0, %c0_1] : memref<1x4x256xf32, #tpu.memory_space<vmem>>, vector<1x4x256xf32>
    %1 = vector.shape_cast %0 : vector<1x4x256xf32> to vector<4x256xf32>
    %c0_2 = arith.constant 0 : index
    %c0_3 = arith.constant 0 : index
    %2 = vector.load %arg3[%c0_2, %c0_3] : memref<8x4xf32, #tpu.memory_space<vmem>>, vector<8x4xf32>
    %c0_4 = arith.constant 0 : index
    %c0_5 = arith.constant 0 : index
    %3 = vector.load %arg4[%c0_4, %c0_5] : memref<8x1xf32, #tpu.memory_space<vmem>>, vector<8x1xf32>
    %cst = arith.constant 0.000000e+00 : f32
    %4 = vector.broadcast %cst : f32 to vector<8x256xf32>
    %5 = vector.extract_strided_slice %2 {offsets = [0, 0], sizes = [8, 1], strides = [1, 1]} : vector<8x4xf32> to vector<8x1xf32>
    %6 = vector.extract_strided_slice %1 {offsets = [0, 0], sizes = [1, 256], strides = [1, 1]} : vector<4x256xf32> to vector<1x256xf32>
    %7 = vector.broadcast %5 : vector<8x1xf32> to vector<8x256xf32>
    %8 = vector.broadcast %6 : vector<1x256xf32> to vector<8x256xf32>
    %9 = arith.mulf %7, %8 : vector<8x256xf32>
    %10 = arith.addf %4, %9 : vector<8x256xf32>
    %11 = vector.extract_strided_slice %2 {offsets = [0, 1], sizes = [8, 1], strides = [1, 1]} : vector<8x4xf32> to vector<8x1xf32>
    %12 = vector.extract_strided_slice %1 {offsets = [1, 0], sizes = [1, 256], strides = [1, 1]} : vector<4x256xf32> to vector<1x256xf32>
    %13 = vector.broadcast %11 : vector<8x1xf32> to vector<8x256xf32>
    %14 = vector.broadcast %12 : vector<1x256xf32> to vector<8x256xf32>
    %15 = arith.mulf %13, %14 : vector<8x256xf32>
    %16 = arith.addf %10, %15 : vector<8x256xf32>
    %17 = vector.extract_strided_slice %2 {offsets = [0, 2], sizes = [8, 1], strides = [1, 1]} : vector<8x4xf32> to vector<8x1xf32>
    %18 = vector.extract_strided_slice %1 {offsets = [2, 0], sizes = [1, 256], strides = [1, 1]} : vector<4x256xf32> to vector<1x256xf32>
    %19 = vector.broadcast %17 : vector<8x1xf32> to vector<8x256xf32>
    %20 = vector.broadcast %18 : vector<1x256xf32> to vector<8x256xf32>
    %21 = arith.mulf %19, %20 : vector<8x256xf32>
    %22 = arith.addf %16, %21 : vector<8x256xf32>
    %23 = vector.extract_strided_slice %2 {offsets = [0, 3], sizes = [8, 1], strides = [1, 1]} : vector<8x4xf32> to vector<8x1xf32>
    %24 = vector.extract_strided_slice %1 {offsets = [3, 0], sizes = [1, 256], strides = [1, 1]} : vector<4x256xf32> to vector<1x256xf32>
    %25 = vector.broadcast %23 : vector<8x1xf32> to vector<8x256xf32>
    %26 = vector.broadcast %24 : vector<1x256xf32> to vector<8x256xf32>
    %27 = arith.mulf %25, %26 : vector<8x256xf32>
    %28 = arith.addf %22, %27 : vector<8x256xf32>
    %29 = vector.broadcast %3 : vector<8x1xf32> to vector<8x256xf32>
    %30 = arith.addf %28, %29 : vector<8x256xf32>
    %c0_6 = arith.constant 0 : index
    %c0_7 = arith.constant 0 : index
    %c0_8 = arith.constant 0 : index
    %31 = vector.load %arg5[%c0_6, %c0_7, %c0_8] : memref<1x8x256xf32, #tpu.memory_space<vmem>>, vector<1x8x256xf32>
    %32 = vector.shape_cast %31 : vector<1x8x256xf32> to vector<8x256xf32>
    %33 = vector.shape_cast %30 : vector<8x256xf32> to vector<1x8x256xf32>
    tpu.vector_store %arg5[%c0_6, %c0_7, %c0_8], %33 {strides = array<i32>} : memref<1x8x256xf32, #tpu.memory_space<vmem>>, vector<1x8x256xf32>,
    return
  }
  func.func @transform_0(%arg0: i32, %arg1: i32) -> (i32, i32, i32) {
    %c0_i32 = arith.constant 0 : i32
    %c0_i32_0 = arith.constant 0 : i32
    return %arg0, %c0_i32, %arg1 : i32, i32, i32
  }
  func.func @transform_1(%arg0: i32, %arg1: i32) -> (i32, i32) {
    %c0_i32 = arith.constant 0 : i32
    %c0_i32_0 = arith.constant 0 : i32
    %c0_i32_1 = arith.constant 0 : i32
    return %c0_i32, %c0_i32_0 : i32, i32
  }
  func.func @transform_2(%arg0: i32, %arg1: i32) -> (i32, i32) {
    %c0_i32 = arith.constant 0 : i32
    %c0_i32_0 = arith.constant 0 : i32
    %c0_i32_1 = arith.constant 0 : i32
    return %c0_i32, %c0_i32_0 : i32, i32
  }
  func.func @transform_3(%arg0: i32, %arg1: i32) -> (i32, i32, i32) {
    %c0_i32 = arith.constant 0 : i32
    %c0_i32_0 = arith.constant 0 : i32
    return %arg0, %c0_i32, %arg1 : i32, i32, i32
  }
}

</mosaic_0001>

<bundles_post_ra>
// kernel: tpu_custom_call.1
= control target key start
LH: loop header
LB: loop body
LE: loop exit
PB: predicated region body
PF: predicated region fallthrough
CT: control target
= control target key end

     0   :  { %8 = vsyncpa [#allocation3], 0  ;;  %s709_s0 = inlined_call_operand.vmem [shape: f32[2,4,256], index: 0, kind: input, shape index: {}]   ;;  %s710_s1 = inlined_call_operand.vmem [shape: f32[8,4], index: 1, kind: input, shape index: {}]   ;;  %s711_s2 = inlined_call_operand.vmem [shape: f32[8,1], index: 2, kind: input, shape index: {}]   ;;  %s712_s3 = inlined_call_operand.hbm [shape: f32[2,8,256], index: 3, kind: output, shape index: {}]  }
   0x1   :  { %10 = vsyncpa [#allocation3 + $0x1], 0  ;;  %s594_s12 = smov 0   ;;  %s596_s13 = smov 0  }
   0x2   :  { %s598_s14 = smov 0   ;;  %s600_s15 = smov 0  }
   0x3   :  { %s602_s16 = smov 0   ;;  %s604_s17 = smov 0  }
   0x4 LB: > { %s411_s18 = sadd.s32 4294967295, %s567_s17   ;;  %s412_s19 = sadd.s32 4294967294, %s567_s17   ;;  %s567_s17 = sphi %s604_s17, %s16_s17   ;;  %s563_s16 = sphi %s602_s16, %s719_s16   ;;  %s559_s15 = sphi %s600_s15, %s718_s15   ;;  %s555_s14 = sphi %s598_s14, %s717_s14   ;;  %s551_s13 = sphi %s596_s13, %s716_s13   ;;  %s547_s12 = sphi %s594_s12, %s715_s12  }
   0x5   : > { %s28_s20 = sadd.s32 1, %s563_s16  ;;  %s107_s21 = sadd.s32 1, %s555_s14 }
   0x6   : > { %p30_p0 = scmp.ge.s32.totalorder %s28_s20, 2  ;;  %p117_p1 = scmp.ne.s32.totalorder %s555_s14, %s551_s13 }
   0x7   : > { %p118_p2 = scmp.eq.s32.totalorder %s411_s18, 1  ;;  %p123_p3 = scmp.ne.s32.totalorder %s551_s13, %s547_s12 }
   0x8   : > { %s721_s20 = smov (%p30_p0, %s28_s20), 0  ;;  %p124_p5 = scmp.eq.s32.totalorder %s412_s19, 1 }
   0x9   : > { %p634_p4 = por %p118_p2, %p117_p1  ;;  %s102_s23 = ssub.s32 %s563_s16, %s721_s20 }
   0xa   : > { %p415_p6 = scmp.ge.s32.totalorder %s567_s17, 1  ;;  %p105_p7 = scmp.eq.s32.totalorder %s102_s23, 0 }
   0xb   : > { %p641_p8 = por %p124_p5, %p123_p3  ;;  %p161_p9 = scmp.lt.s32.totalorder %s567_s17, 3 }
   0xc   : > { %s647_s25 = scalar_select %p105_p7, %s555_s14, %s107_s21  }
   0xd   : > { %p162_p10 = pnand %p415_p6, %p161_p9 }
   0xe   : > { %p190_p11 = scmp.lt.s32.totalorder (!%p162_p10), %s559_s15, 1  ;;  %s186_s8 = sand.u32 (!%p162_p10), 1, %s551_s13  }
   0xf   : > { %165 = sbr.rel (%p162_p10) target bundleno = 174 (0xae), region = 32  ;;  %s416_s9 = sshll.u32 (!%p162_p10), %s186_s8, 4 }
  0x10   : > { %s425_s10 = sshll.u32 (!%p162_p10), %s559_s15, 8  ;;  %s188_s11 = scalar_lea.vmem (!%p162_p10), [#allocation2], %s416_s9 }
  0x11   : > { %s335_s18 = sshll.u32 (!%p162_p10), %s188_s11, 4  ;;  %s667_s23 = scalar_lea.hbm (!%p162_p10), %s712_s3, %s425_s10  ;;  %s336_s18 = int_to_ptr.vmem [resolvable:$true] %s335_s18 }
  0x12   : > { %s319_s26 = scalar_lea.sflag (!%p162_p10), [#allocation3], %s186_s8  ;;  %s491_s27 = scalar_lea.vmem (!%p162_p10), %s336_s18, 256 }
  0x13   : > { %p492_p12 = scmp.ne.s32.totalorder (!%p162_p10), %s336_s18, %s491_s27 }
  0x14   : > { %v201_v0 = vld [vmem:[%s710_s1] sm:$0xff]  ;;  %v569_v1 = vmov 0   ;;  %v570_v2 = vmov 2   ;;  %v571_v3 = vmov 1   ;;  %v572_v4 = vmov 3   ;;  %s191_s30 = scalar_select %p190_p11, %s559_s15, 1 }
  0x15   : > { %485 = vset.pattern.permute.xlu0 %v569_v1  ;;  %487 = vset.pattern.permute.xlu1 %v570_v2  ;;  %v202_v5 = vld [vmem:[%s711_s2] sm:$0xff]  ;;  %v209_v6 = vlaneseq  ;;  %p493_p13 = pnand %p492_p12, %p634_p4  ;;  %s573_s15 = smov [#allocation2]  }
  0x16   : > { %205 = vperm.xlu0 %485, %v201_v0   ;;  %258 = vperm.xlu1 %487, %v201_v0   ;;  %s424_s4 = sshll.u32 %s191_s30, 3  ;;  %s495_s28 = sshll.u32 %s573_s15, 4  ;;  %s496_s28 = int_to_ptr.vmem [resolvable:$false] %s495_s28 }
  0x17   : > { %v210_v7 = vshrl.u32 %v209_v6, 7  ;;  %s197_s7 = scalar_lea.vmem %s709_s0, %s424_s4  ;;  %p494_p0 = pneg %p493_p13 }
  0x18   : > { %v200_v12 = vld [vmem:[%s197_s7] sm:$0xff]  ;;  %s497_s29 = scalar_lea.vmem %s496_s28, 512  ;;  %p498_p1 = scmp.lt.s32.totalorder %s336_s18, %s496_s28 }
  0x19   : > { %v211_v8 = vsub.s32 0, %v210_v7  ;;  %v215_v9 = vsub.s32 4, %v210_v7  ;;  %v237_v10 = vsub.s32 1, %v210_v7  ;;  %v241_v11 = vsub.s32 5, %v210_v7  ;;  %p499_p2 = scmp.lt.s32.totalorder %s497_s29, %s491_s27 }
  0x1a   : > { %486 = vset.pattern.permute.xlu0 %v571_v3  ;;  %488 = vset.pattern.permute.xlu1 %v572_v4  ;;  %v263_v13 = vsub.s32 2, %v210_v7  ;;  %v267_v14 = vsub.s32 6, %v210_v7  ;;  %v289_v15 = vsub.s32 3, %v210_v7  ;;  %v293_v16 = vsub.s32 7, %v210_v7 }
  0x1b   : > { %232 = vperm.xlu0 %486, %v201_v0   ;;  %284 = vperm.xlu1 %488, %v201_v0   ;;  %v212_v17 = vrot.slane %v200_v12, %v211_v8  ;;  %v216_v18 = vrot.slane %v200_v12, %v215_v9  ;;  %v238_v19 = vrot.slane %v200_v12, %v237_v10  ;;  %p500_p3 = por %p499_p2, %p498_p1 }
  0x1c   : > { %v242_v20 = vrot.slane %v200_v12, %v241_v11  ;;  %v264_v21 = vrot.slane %v200_v12, %v263_v13  ;;  %v268_v22 = vrot.slane %v200_v12, %v267_v14  ;;  %v290_v25 = vrot.slane %v200_v12, %v289_v15 }
  0x1d   : > { %v294_v26 = vrot.slane %v200_v12, %v293_v16  ;;  %v222_v27 = vrot.slane %v212_v17, %v211_v8  ;;  %v226_v28 = vrot.slane %v216_v18, %v211_v8  ;;  %v248_v29 = vrot.slane %v238_v19, %v237_v10  ;;  %p501_p5 = pnand %p500_p3, %p494_p0 }
  0x1e   : > { %v252_v30 = vrot.slane %v242_v20, %v237_v10  ;;  %v274_v31 = vrot.slane %v264_v21, %v263_v13  ;;  %v278_v32 = vrot.slane %v268_v22, %v263_v13  ;;  %v300_v33 = vrot.slane %v290_v25, %v289_v15 }
  0x1f   : > { %489 = vset.pattern.permute.xlu1 %v569_v1  ;;  %490 = vset.pattern.permute.xlu0 %v569_v1  ;;  %v304_v34 = vrot.slane %v294_v26, %v289_v15 }
  0x20   : > { %311 = vperm.xlu1 %489, %v202_v5  }
  0x91   : > { %v206_v23 = vpop.permute.xlu0 %205  ;;  %v259_v24 = vpop.permute.xlu1 %258 }
  0x92   : > { %v227_v37 = vmul.f32 %v222_v27, %v206_v23  ;;  %v228_v38 = vmul.f32 %v226_v28, %v206_v23  ;;  %v279_v41 = vmul.f32 %v274_v31, %v259_v24  ;;  %v280_v42 = vmul.f32 %v278_v32, %v259_v24 }
  0x96   : > { %v233_v35 = vpop.permute.xlu0 %232  ;;  %v285_v36 = vpop.permute.xlu1 %284 }
  0x97   : > { %v253_v39 = vmul.f32 %v248_v29, %v233_v35  ;;  %v254_v40 = vmul.f32 %v252_v30, %v233_v35  ;;  %v305_v45 = vmul.f32 %v300_v33, %v285_v36  ;;  %v306_v46 = vmul.f32 %v304_v34, %v285_v36 }
  0x99   : > { %v255_v43 = vadd.f32 %v253_v39, %v227_v37  ;;  %v256_v44 = vadd.f32 %v254_v40, %v228_v38 }
  0x9b   : > { %v281_v47 = vadd.f32 %v279_v41, %v255_v43  ;;  %v282_v48 = vadd.f32 %v280_v42, %v256_v44  ;;  %v312_v49 = vpop.permute.xlu1 %311 }
  0x9d   : > { %v307_v50 = vadd.f32 %v305_v45, %v281_v47  ;;  %v308_v51 = vadd.f32 %v306_v46, %v282_v48 }
  0x9f   : > { %v314_v52 = vadd.f32 %v312_v49, %v307_v50  ;;  %v315_v53 = vadd.f32 %v312_v49, %v308_v51 }
  0xa1   : > { %316 = vst [vmem:[%s188_s11] sm:$0xff] %v314_v52  ;;  %317 = vst [vmem:[%s188_s11 + $0x8] sm:$0xff] %v315_v53 }
  0xa2   : > { %504 = shalt.err (!%p501_p5)
}
  0xa3   : > { %s505_s30 = scalar_lea.hbm %s667_s23, 256  ;;  %s509_s6 = scalar_lea.hbm %s712_s3, 512 }
  0xa4   : > { %p506_p6 = scmp.ne.s32.totalorder %s667_s23, %s505_s30  ;;  %p510_p10 = scmp.lt.s32.totalorder %s667_s23, %s712_s3 }
  0xa5   : > { %p511_p11 = scmp.lt.s32.totalorder %s509_s6, %s505_s30 }
  0xa6   : > { %p507_p7 = pnand %p506_p6, %p634_p4 }
  0xa7   : > { %p512_p12 = por %p511_p11, %p510_p10 }
  0xa8   : > { %p508_p9 = pneg %p507_p7 }
  0xaa   : > { %p513_p13 = pnand %p512_p12, %p508_p9 }
  0xac   : > { %516 = shalt.err (!%p513_p13)
}
  0xad   : > { %426 = dma.vmem_to_hbm [thread:$0]  (%p634_p4), %s336_s18, 256, %s667_s23, %s319_s26  }
  0xae PF: > { %p432_p0 = scmp.ge.s32.totalorder %s567_s17, 2  ;;  %s347_s9 = sand.u32 1, %s547_s12  }
  0xaf   : > { %s348_s10 = scalar_lea.sflag [#allocation3], %s347_s9 }
  0xb0   : > { %p429_p1 = pnand %p432_p0, %p641_p8 }
  0xb2   : > { %p430_p2 = pneg %p429_p1 }
  0xb4   : > { %542 = dma.done.wait (%p430_p2), %s348_s10, 256  }
  0xb5   : > { %544 = vsyncadd (%p430_p2), %s348_s10, 4294967040  ;;  %s16_s17 = sadd.s32 1, %s567_s17   ;;  %s715_s12 = smov %s551_s13 }
  0xb6   : > { %p13_p3 = scmp.ge.s32.totalorder %s16_s17, 4   ;;  %s716_s13 = smov %s555_s14 }
  0xb7   : > { %s717_s14 = smov %s647_s25  ;;  %s718_s15 = smov %s563_s16 }
  0xb8   : > { %s719_s16 = smov %s721_s20  ;;  %15 = sbr.rel (!%p13_p3) target bundleno = 4 (0x4), region = 67 }
  0xbd   :  { %353 = vsyncpa [#allocation3], 1 }
  0xbe   :  { %355 = vsyncpa [#allocation3 + $0x1], 1 }

</bundles_post_ra>
